<compile_context>
chip_gen: v5e
topology: v5e:2x2
jax: 0.10.0
libtpu: 0.0.40
codegen_flags: <defaults>
</compile_context>

<pallas_src>
import jax
import jax.numpy as jnp
from jax.experimental import pallas as pl
from jax.experimental.pallas import tpu as pltpu

LANE = 128
NEG_BIG = -1e30  # fill for padded output lanes: exp(NEG_BIG - m) == 0


def _round_up(n, m):
    return (n + m - 1) // m * m


def pg_forward_kernel(x_ref, w1_ref, b1_ref, w2_ref, b2_ref, w3_ref, b3_ref, o_ref):
    # x block: (TM, OBS_P) f32; weights are bf16, biases f32.
    # Matmuls run on the MXU in bf16 with f32 accumulation; elementwise in f32.
    x = x_ref[...].astype(jnp.bfloat16)

    # Linear 1 + ReLU
    h1 = jnp.dot(x, w1_ref[...], preferred_element_type=jnp.float32) + b1_ref[...]
    h1 = jnp.maximum(h1, 0.0)

    # Linear 2 + ReLU
    h2 = jnp.dot(h1.astype(jnp.bfloat16), w2_ref[...],
                 preferred_element_type=jnp.float32) + b2_ref[...]
    h2 = jnp.maximum(h2, 0.0)

    # Linear 3 (padded lanes carry bias = -1e30 -> vanish under softmax)
    logits = jnp.dot(h2.astype(jnp.bfloat16), w3_ref[...],
                     preferred_element_type=jnp.float32) + b3_ref[...]

    # Numerically stable softmax over the lane-dense feature axis.
    m = jnp.max(logits, axis=-1, keepdims=True)
    e = jnp.exp(logits - m)
    denom = jnp.sum(e, axis=-1, keepdims=True)
    # EUP approximate reciprocal + one Newton step to recover ~f32 accuracy.
    inv = pl.reciprocal(denom, approx=True)
    inv = inv * (2.0 - denom * inv)
    o_ref[...] = (e * inv).astype(o_ref.dtype)


def pg_network_forward(x, params, *, tm=256):
    """x: (B, num_obs) float32. params: dict of f32 weights/biases (W as (in, out))."""
    B, num_obs = x.shape
    hidden = params["w2"].shape[1]
    num_act = params["w3"].shape[1]

    obs_p = _round_up(num_obs, LANE)     # padded input width
    hid1_p = _round_up(num_obs, LANE)    # Linear(num_obs, num_obs)
    hid2_p = _round_up(hidden, LANE)
    act_p = _round_up(num_act, LANE)     # lane-dense output width

    def pad2(a, rows, cols, fill=0.0):
        return jnp.pad(a, ((0, rows - a.shape[0]), (0, cols - a.shape[1])),
                       constant_values=fill)

    # Zero-pad weights (bf16 for the MXU); biases stay f32.  Padded hidden
    # features end up exactly 0 after ReLU, so they never perturb real outputs.
    w1 = pad2(params["w1"], obs_p, hid1_p).astype(jnp.bfloat16)
    b1 = pad2(params["b1"], 1, hid1_p).astype(jnp.float32)
    w2 = pad2(params["w2"], hid1_p, hid2_p).astype(jnp.bfloat16)
    b2 = pad2(params["b2"], 1, hid2_p).astype(jnp.float32)
    w3 = pad2(params["w3"], hid2_p, act_p).astype(jnp.bfloat16)
    b3 = pad2(params["b3"], 1, act_p, fill=NEG_BIG).astype(jnp.float32)

    # Batch tiling: TM capped at `tm` (multiple of 8), batch padded to a
    # multiple of TM so every block is full (no masked partial stores).
    tm_eff = min(tm, _round_up(B, 8))
    b_pad = _round_up(B, tm_eff)
    x_p = x.astype(jnp.float32)
    if b_pad != B or obs_p != num_obs:
        x_p = jnp.pad(x_p, ((0, b_pad - B), (0, obs_p - num_obs)))
    grid = (b_pad // tm_eff,)

    flops = 2 * b_pad * (obs_p * hid1_p + hid1_p * hid2_p + hid2_p * act_p)
    bytes_accessed = (b_pad * obs_p * 4 + b_pad * act_p * 4
                      + (w1.size + w2.size + w3.size) * 2
                      + (b1.size + b2.size + b3.size) * 4)
    cost = pl.CostEstimate(flops=flops,
                           transcendentals=b_pad * act_p,
                           bytes_accessed=bytes_accessed)

    out = pl.pallas_call(
        pg_forward_kernel,
        out_shape=jax.ShapeDtypeStruct((b_pad, act_p), jnp.float32),
        grid=grid,
        in_specs=[
            pl.BlockSpec((tm_eff, obs_p), lambda i: (i, 0)),   # x: tiled over batch
            pl.BlockSpec((obs_p, hid1_p), lambda i: (0, 0)),   # w1: VMEM-resident
            pl.BlockSpec((1, hid1_p), lambda i: (0, 0)),       # b1
            pl.BlockSpec((hid1_p, hid2_p), lambda i: (0, 0)),  # w2
            pl.BlockSpec((1, hid2_p), lambda i: (0, 0)),       # b2
            pl.BlockSpec((hid2_p, act_p), lambda i: (0, 0)),   # w3
            pl.BlockSpec((1, act_p), lambda i: (0, 0)),        # b3
        ],
        out_specs=pl.BlockSpec((tm_eff, act_p), lambda i: (i, 0)),
        compiler_params=pltpu.CompilerParams(
            dimension_semantics=("parallel",)),
        cost_estimate=cost,
    )(x_p, w1, b1, w2, b2, w3, b3)

    return out[:B, :num_act]


def init_params(key, num_obs, num_act, hidden=128):
    """Mimics nn.Linear init: uniform(-1/sqrt(fan_in), 1/sqrt(fan_in)).
    Weights stored as (in_features, out_features); biases as (1, out_features)."""
    def linear(k, fan_in, fan_out):
        kw, kb = jax.random.split(k)
        bound = 1.0 / jnp.sqrt(fan_in)
        w = jax.random.uniform(kw, (fan_in, fan_out), jnp.float32, -bound, bound)
        b = jax.random.uniform(kb, (1, fan_out), jnp.float32, -bound, bound)
        return w, b

    k1, k2, k3 = jax.random.split(key, 3)
    w1, b1 = linear(k1, num_obs, num_obs)
    w2, b2 = linear(k2, num_obs, hidden)
    w3, b3 = linear(k3, hidden, num_act)
    return dict(w1=w1, b1=b1, w2=w2, b2=b2, w3=w3, b3=b3)


def pg_network_ref(x, p):
    """Pure-JAX f32 reference (matches the PyTorch forward)."""
    h1 = jax.nn.relu(x @ p["w1"] + p["b1"])
    h2 = jax.nn.relu(h1 @ p["w2"] + p["b2"])
    logits = h2 @ p["w3"] + p["b3"]
    return jax.nn.softmax(logits, axis=1)


if __name__ == "__main__":
    num_obs, num_act = 32, 8

    key = jax.random.PRNGKey(0)
    kx, kp, kx2 = jax.random.split(key, 3)
    params = init_params(kp, num_obs, num_act)

    # Case 1: tiny batch (matches the toy spec shapes).
    x = jax.random.normal(kx, (8, num_obs), jnp.float32)
    out = jax.block_until_ready(pg_network_forward(x, params))
    ref = pg_network_ref(x, params)
    assert out.shape == (8, num_act)
    assert jnp.allclose(jnp.sum(out, axis=1), 1.0, atol=1e-4)
    # bf16 MXU operands with f32 accumulation -> slightly relaxed tolerance.
    assert jnp.allclose(out, ref, atol=2e-2, rtol=0.0)

    # Case 2: non-multiple batch exercising grid > 1 and batch padding.
    x2 = jax.random.normal(kx2, (300, num_obs), jnp.float32)
    out2 = jax.block_until_ready(pg_network_forward(x2, params, tm=128))
    ref2 = pg_network_ref(x2, params)
    assert out2.shape == (300, num_act)
    assert jnp.allclose(jnp.sum(out2, axis=1), 1.0, atol=1e-4)
    assert jnp.allclose(out2, ref2, atol=2e-2, rtol=0.0)

    print("KERNEL_OK")
</pallas_src>

<mosaic_0001>
module attributes {stable_mosaic.version = 11 : i64} {
  func.func @pg_forward_kernel(%arg0: i32, %arg1: memref<8x128xf32, #tpu.memory_space<vmem>>, %arg2: memref<128x128xbf16, #tpu.memory_space<vmem>>, %arg3: memref<1x128xf32, #tpu.memory_space<vmem>>, %arg4: memref<128x128xbf16, #tpu.memory_space<vmem>>, %arg5: memref<1x128xf32, #tpu.memory_space<vmem>>, %arg6: memref<128x128xbf16, #tpu.memory_space<vmem>>, %arg7: memref<1x128xf32, #tpu.memory_space<vmem>>, %arg8: memref<8x128xf32, #tpu.memory_space<vmem>>) attributes {dimension_semantics = [#tpu.dimension_semantics<parallel>], iteration_bounds = array<i64: 1>, scalar_prefetch = 0 : i64, scratch_operands = 0 : i64, tpu.core_type = #tpu.core_type<tc>, window_params = [{transform_indices = @transform_0, window_bounds = array<i64: 8, 128>}, {pipeline_mode = #tpu.pipeline_mode<synchronous>, transform_indices = @transform_1, window_bounds = array<i64: 128, 128>}, {pipeline_mode = #tpu.pipeline_mode<synchronous>, transform_indices = @transform_2, window_bounds = array<i64: 1, 128>}, {pipeline_mode = #tpu.pipeline_mode<synchronous>, transform_indices = @transform_3, window_bounds = array<i64: 128, 128>}, {pipeline_mode = #tpu.pipeline_mode<synchronous>, transform_indices = @transform_4, window_bounds = array<i64: 1, 128>}, {pipeline_mode = #tpu.pipeline_mode<synchronous>, transform_indices = @transform_5, window_bounds = array<i64: 128, 128>}, {pipeline_mode = #tpu.pipeline_mode<synchronous>, transform_indices = @transform_6, window_bounds = array<i64: 1, 128>}, {transform_indices = @transform_7, window_bounds = array<i64: 8, 128>}]} {
    %c0 = arith.constant 0 : index
    %c0_0 = arith.constant 0 : index
    %0 = vector.load %arg1[%c0, %c0_0] : memref<8x128xf32, #tpu.memory_space<vmem>>, vector<8x128xf32>
    %1 = arith.truncf %0 : vector<8x128xf32> to vector<8x128xbf16>
    %c0_1 = arith.constant 0 : index
    %c0_2 = arith.constant 0 : index
    %2 = vector.load %arg2[%c0_1, %c0_2] : memref<128x128xbf16, #tpu.memory_space<vmem>>, vector<128x128xbf16>
    %cst = arith.constant dense<0.000000e+00> : vector<8x128xf32>
    %3 = tpu.matmul %1, %2, %cst {dimension_numbers = #tpu.dot_dimension_numbers<[1], [0], [0], [1], [0, 0, 1, 1], [], []>} : vector<8x128xbf16>, vector<128x128xbf16>, vector<8x128xf32> -> vector<8x128xf32>
    %c0_3 = arith.constant 0 : index
    %c0_4 = arith.constant 0 : index
    %4 = vector.load %arg3[%c0_3, %c0_4] : memref<1x128xf32, #tpu.memory_space<vmem>>, vector<1x128xf32>
    %5 = vector.broadcast %4 : vector<1x128xf32> to vector<8x128xf32>
    %6 = arith.addf %3, %5 : vector<8x128xf32>
    %cst_5 = arith.constant 0.000000e+00 : f32
    %7 = vector.broadcast %cst_5 : f32 to vector<8x128xf32>
    %8 = arith.maximumf %6, %7 : vector<8x128xf32>
    %9 = arith.truncf %8 : vector<8x128xf32> to vector<8x128xbf16>
    %c0_6 = arith.constant 0 : index
    %c0_7 = arith.constant 0 : index
    %10 = vector.load %arg4[%c0_6, %c0_7] : memref<128x128xbf16, #tpu.memory_space<vmem>>, vector<128x128xbf16>
    %cst_8 = arith.constant dense<0.000000e+00> : vector<8x128xf32>
    %11 = tpu.matmul %9, %10, %cst_8 {dimension_numbers = #tpu.dot_dimension_numbers<[1], [0], [0], [1], [0, 0, 1, 1], [], []>} : vector<8x128xbf16>, vector<128x128xbf16>, vector<8x128xf32> -> vector<8x128xf32>
    %c0_9 = arith.constant 0 : index
    %c0_10 = arith.constant 0 : index
    %12 = vector.load %arg5[%c0_9, %c0_10] : memref<1x128xf32, #tpu.memory_space<vmem>>, vector<1x128xf32>
    %13 = vector.broadcast %12 : vector<1x128xf32> to vector<8x128xf32>
    %14 = arith.addf %11, %13 : vector<8x128xf32>
    %cst_11 = arith.constant 0.000000e+00 : f32
    %15 = vector.broadcast %cst_11 : f32 to vector<8x128xf32>
    %16 = arith.maximumf %14, %15 : vector<8x128xf32>
    %17 = arith.truncf %16 : vector<8x128xf32> to vector<8x128xbf16>
    %c0_12 = arith.constant 0 : index
    %c0_13 = arith.constant 0 : index
    %18 = vector.load %arg6[%c0_12, %c0_13] : memref<128x128xbf16, #tpu.memory_space<vmem>>, vector<128x128xbf16>
    %cst_14 = arith.constant dense<0.000000e+00> : vector<8x128xf32>
    %19 = tpu.matmul %17, %18, %cst_14 {dimension_numbers = #tpu.dot_dimension_numbers<[1], [0], [0], [1], [0, 0, 1, 1], [], []>} : vector<8x128xbf16>, vector<128x128xbf16>, vector<8x128xf32> -> vector<8x128xf32>
    %c0_15 = arith.constant 0 : index
    %c0_16 = arith.constant 0 : index
    %20 = vector.load %arg7[%c0_15, %c0_16] : memref<1x128xf32, #tpu.memory_space<vmem>>, vector<1x128xf32>
    %21 = vector.broadcast %20 : vector<1x128xf32> to vector<8x128xf32>
    %22 = arith.addf %19, %21 : vector<8x128xf32>
    %cst_17 = arith.constant dense<0xFF800000> : vector<8xf32>
    %23 = vector.multi_reduction <maximumf>, %22, %cst_17 [1] : vector<8x128xf32> to vector<8xf32>
    %24 = vector.shape_cast %23 : vector<8xf32> to vector<8x1xf32>
    %25 = vector.broadcast %24 : vector<8x1xf32> to vector<8x128xf32>
    %26 = arith.subf %22, %25 : vector<8x128xf32>
    %27 = math.exp %26 : vector<8x128xf32>
    %cst_18 = arith.constant dense<0.000000e+00> : vector<8xf32>
    %28 = vector.multi_reduction <add>, %27, %cst_18 [1] : vector<8x128xf32> to vector<8xf32>
    %29 = vector.shape_cast %28 : vector<8xf32> to vector<8x1xf32>
    %30 = tpu.reciprocal %29 {approx = true} : vector<8x1xf32> -> vector<8x1xf32>
    %31 = arith.mulf %29, %30 : vector<8x1xf32>
    %cst_19 = arith.constant 2.000000e+00 : f32
    %32 = vector.broadcast %cst_19 : f32 to vector<8x1xf32>
    %33 = arith.subf %32, %31 : vector<8x1xf32>
    %34 = arith.mulf %30, %33 : vector<8x1xf32>
    %35 = vector.broadcast %34 : vector<8x1xf32> to vector<8x128xf32>
    %36 = arith.mulf %27, %35 : vector<8x128xf32>
    %c0_20 = arith.constant 0 : index
    %c0_21 = arith.constant 0 : index
    %37 = vector.load %arg8[%c0_20, %c0_21] : memref<8x128xf32, #tpu.memory_space<vmem>>, vector<8x128xf32>
    tpu.vector_store %arg8[%c0_20, %c0_21], %36 {strides = array<i32>} : memref<8x128xf32, #tpu.memory_space<vmem>>, vector<8x128xf32>,
    return
  }
  func.func @transform_0(%arg0: i32) -> (i32, i32) {
    %c0_i32 = arith.constant 0 : i32
    %c0_i32_0 = arith.constant 0 : i32
    return %arg0, %c0_i32 : i32, i32
  }
  func.func @transform_1(%arg0: i32) -> (i32, i32) {
    %c0_i32 = arith.constant 0 : i32
    %c0_i32_0 = arith.constant 0 : i32
    %c0_i32_1 = arith.constant 0 : i32
    return %c0_i32, %c0_i32_0 : i32, i32
  }
  func.func @transform_2(%arg0: i32) -> (i32, i32) {
    %c0_i32 = arith.constant 0 : i32
    %c0_i32_0 = arith.constant 0 : i32
    %c0_i32_1 = arith.constant 0 : i32
    return %c0_i32, %c0_i32_0 : i32, i32
  }
  func.func @transform_3(%arg0: i32) -> (i32, i32) {
    %c0_i32 = arith.constant 0 : i32
    %c0_i32_0 = arith.constant 0 : i32
    %c0_i32_1 = arith.constant 0 : i32
    return %c0_i32, %c0_i32_0 : i32, i32
  }
  func.func @transform_4(%arg0: i32) -> (i32, i32) {
    %c0_i32 = arith.constant 0 : i32
    %c0_i32_0 = arith.constant 0 : i32
    %c0_i32_1 = arith.constant 0 : i32
    return %c0_i32, %c0_i32_0 : i32, i32
  }
  func.func @transform_5(%arg0: i32) -> (i32, i32) {
    %c0_i32 = arith.constant 0 : i32
    %c0_i32_0 = arith.constant 0 : i32
    %c0_i32_1 = arith.constant 0 : i32
    return %c0_i32, %c0_i32_0 : i32, i32
  }
  func.func @transform_6(%arg0: i32) -> (i32, i32) {
    %c0_i32 = arith.constant 0 : i32
    %c0_i32_0 = arith.constant 0 : i32
    %c0_i32_1 = arith.constant 0 : i32
    return %c0_i32, %c0_i32_0 : i32, i32
  }
  func.func @transform_7(%arg0: i32) -> (i32, i32) {
    %c0_i32 = arith.constant 0 : i32
    %c0_i32_0 = arith.constant 0 : i32
    return %arg0, %c0_i32 : i32, i32
  }
}

</mosaic_0001>

<bundles_post_ra>
// kernel: tpu_custom_call.1
= control target key start
LH: loop header
LB: loop body
LE: loop exit
PB: predicated region body
PF: predicated region fallthrough
CT: control target
= control target key end

     0   :  { %12 = vsyncpa [#allocation3], 0  ;;  %s702_s0 = inlined_call_operand.hbm [shape: f32[8,128], index: 0, kind: input, shape index: {}]   ;;  %s703_s1 = inlined_call_operand.hbm [shape: bf16[128,128], index: 1, kind: input, shape index: {}]   ;;  %s704_s2 = inlined_call_operand.vmem [shape: f32[1,128], index: 2, kind: input, shape index: {}]   ;;  %s705_s3 = inlined_call_operand.hbm [shape: bf16[128,128], index: 3, kind: input, shape index: {}]   ;;  %s706_s4 = inlined_call_operand.vmem [shape: f32[1,128], index: 4, kind: input, shape index: {}]   ;;  %s707_s5 = inlined_call_operand.hbm [shape: bf16[128,128], index: 5, kind: input, shape index: {}]   ;;  %s708_s6 = inlined_call_operand.vmem [shape: f32[1,128], index: 6, kind: input, shape index: {}]   ;;  %s709_s7 = inlined_call_operand.hbm [shape: f32[8,128], index: 7, kind: output, shape index: {}]  }
   0x1   :  { %13 = vsyncpa [#allocation6], 0 }
   0x2   :  { %14 = vsyncpa [#allocation9], 0  ;;  %s31_s26 = sshll.u32 %s703_s1, 4  ;;  %s32_s26 = int_to_ptr.hbm [resolvable:$true] %s31_s26 }
   0x3   :  { %15 = vsyncpa [#allocation4], 0  ;;  %s631_s27 = smov [#allocation5]   ;;  %s21_s8 = sshll.u32 %s702_s0, 4  ;;  %s22_s8 = int_to_ptr.hbm [resolvable:$true] %s21_s8 }
   0x4   :  { %s33_s28 = sshll.u32 %s631_s27, 4  ;;  %s632_s9 = smov 64   ;;  %s34_s28 = int_to_ptr.vmem [resolvable:$true] %s33_s28 }
   0x5   :  { %s633_s10 = smov 4   ;;  %s634_s11 = smov [#allocation2]  }
   0x6   :  { %39 = dma.hbm_to_vmem [thread:$0]  %s32_s26, 1024, %s34_s28, [#allocation6], %s632_s9, %s632_s9, %s633_s10  }
   0x7   :  { %s23_s12 = sshll.u32 %s634_s11, 4  ;;  %s46_s15 = sshll.u32 %s705_s3, 4  ;;  %s24_s12 = int_to_ptr.vmem [resolvable:$true] %s23_s12  ;;  %s47_s15 = int_to_ptr.hbm [resolvable:$true] %s46_s15 }
   0x8   :  { %26 = dma.hbm_to_vmem [thread:$0]  %s22_s8, 128, %s24_s12, [#allocation3]  }
   0x9   :  { %s61_s17 = sshll.u32 %s707_s5, 4  ;;  %s635_s18 = smov [#allocation7]   ;;  %s62_s17 = int_to_ptr.hbm [resolvable:$true] %s61_s17 }
   0xa   :  { %s48_s19 = sshll.u32 %s635_s18, 4  ;;  %s636_s0 = smov [#allocation8]   ;;  %s49_s19 = int_to_ptr.vmem [resolvable:$true] %s48_s19 }
   0xb   :  { %54 = dma.hbm_to_vmem [thread:$0]  %s47_s15, 1024, %s49_s19, [#allocation6], %s632_s9, %s632_s9, %s633_s10  }
   0xc   :  { %s63_s20 = sshll.u32 %s636_s0, 4  ;;  %s64_s20 = int_to_ptr.vmem [resolvable:$true] %s63_s20 }
   0xd   :  { %69 = dma.hbm_to_vmem [thread:$0]  %s62_s17, 1024, %s64_s20, [#allocation9], %s632_s9, %s632_s9, %s633_s10  }
   0xe   :  { %623 = dma.done.wait [#allocation3], 128  }
   0xf   :  { %624 = vsyncadd [#allocation3], 4294967168 }
  0x10   :  { %625 = dma.done.wait [#allocation6], 2048  }
  0x11   :  { %626 = vsyncadd [#allocation6], 4294965248 }
  0x12   :  { %627 = dma.done.wait [#allocation9], 1024  }
  0x13   :  { %628 = vsyncadd [#allocation9], 4294966272  ;;  %v472_v0 = vld [vmem:[#allocation5 + $0x38] sm:$0xff]  ;;  %v471_v1 = vld [vmem:[#allocation5 + $0x30] sm:$0xff] }
  0x14   :  { %158 = vmatpush.bf16.msra.mxu0 %v472_v0  ;;  %v480_v2 = vld [vmem:[#allocation7 + $0x38] sm:$0xff]  ;;  %v479_v3 = vld [vmem:[#allocation7 + $0x30] sm:$0xff]  ;;  %v470_v4 = vld [vmem:[#allocation5 + $0x28] sm:$0xff] }
  0x15   :  { %241 = vmatpush.bf16.msra.mxu1 %v480_v2  ;;  %v478_v5 = vld [vmem:[#allocation7 + $0x28] sm:$0xff]  ;;  %v469_v6 = vld [vmem:[#allocation5 + $0x20] sm:$0xff]  ;;  %v468_v8 = vld [vmem:[#allocation5 + $0x18] sm:$0xff] }
  0x16   :  { %v477_v7 = vld [vmem:[#allocation7 + $0x20] sm:$0xff]  ;;  %v476_v9 = vld [vmem:[#allocation7 + $0x18] sm:$0xff]  ;;  %v467_v10 = vld [vmem:[#allocation5 + $0x10] sm:$0xff] }
  0x17   :  { %v475_v11 = vld [vmem:[#allocation7 + $0x10] sm:$0xff]  ;;  %v466_v12 = vld [vmem:[#allocation5 + $0x8] sm:$0xff]  ;;  %v465_v13 = vld [vmem:[#allocation5] sm:$0xff] }
  0x18   :  { %159 = vmatpush.bf16.msra.mxu0 %v471_v1  ;;  %v88_v14 = vld [vmem:[#allocation2] sm:$0xff]  ;;  %v474_v16 = vld [vmem:[#allocation7 + $0x8] sm:$0xff]  ;;  %v473_v17 = vld [vmem:[#allocation7] sm:$0xff] }
  0x19   :  { %242 = vmatpush.bf16.msra.mxu1 %v479_v3  ;;  %v89_v15 = vpack.c.bf16 %v88_v14, %v88_v14  ;;  %v488_v18 = vld [vmem:[#allocation8 + $0x38] sm:$0xff]  ;;  %v487_v19 = vld [vmem:[#allocation8 + $0x30] sm:$0xff]  ;;  %v486_v20 = vld [vmem:[#allocation8 + $0x28] sm:$0xff] }
  0x1a   :  { %324 = vmatpush.bf16.msra.mxu2 %v488_v18  ;;  %v485_v21 = vld [vmem:[#allocation8 + $0x20] sm:$0xff]  ;;  %v484_v22 = vld [vmem:[#allocation8 + $0x18] sm:$0xff]  ;;  %v483_v23 = vld [vmem:[#allocation8 + $0x10] sm:$0xff] }
  0x1b   :  { %v496_v24 = vld [vmem:[%s704_s2] ss:$0 sm:$0xff]  ;;  %v482_v30 = vld [vmem:[#allocation8 + $0x8] sm:$0xff]  ;;  %v481_v31 = vld [vmem:[#allocation8] sm:$0xff] }
  0x1c   :  { %160 = vmatpush.bf16.msra.mxu0 %v470_v4  ;;  %v497_v32 = vld [vmem:[%s706_s4] ss:$0 sm:$0xff]  ;;  %s637_s4 = smov [#allocation10]  }
  0x1d   :  { %243 = vmatpush.bf16.msra.mxu1 %v478_v5  ;;  %v498_v38 = vld [vmem:[%s708_s6] ss:$0 sm:$0xff]  ;;  %s355_s24 = sshll.u32 %s637_s4, 4  ;;  %s357_s6 = sshll.u32 %s709_s7, 4  ;;  %s356_s24 = int_to_ptr.vmem [resolvable:$true] %s355_s24  ;;  %s358_s6 = int_to_ptr.hbm [resolvable:$true] %s357_s6 }
  0x1e   :  { %325 = vmatpush.bf16.msra.mxu2 %v487_v19 }
  0x20   :  { %161 = vmatpush.bf16.msra.mxu0 %v469_v6 }
  0x21   :  { %244 = vmatpush.bf16.msra.mxu1 %v477_v7 }
  0x22   :  { %326 = vmatpush.bf16.msra.mxu2 %v486_v20 }
  0x24   :  { %162 = vmatpush.bf16.msra.mxu0 %v468_v8 }
  0x25   :  { %245 = vmatpush.bf16.msra.mxu1 %v476_v9 }
  0x26   :  { %327 = vmatpush.bf16.msra.mxu2 %v485_v21 }
  0x28   :  { %163 = vmatpush.bf16.msra.mxu0 %v467_v10 }
  0x29   :  { %246 = vmatpush.bf16.msra.mxu1 %v475_v11 }
  0x2a   :  { %328 = vmatpush.bf16.msra.mxu2 %v484_v22 }
  0x2c   :  { %164 = vmatpush.bf16.msra.mxu0 %v466_v12 }
  0x2d   :  { %247 = vmatpush.bf16.msra.mxu1 %v474_v16 }
  0x2e   :  { %329 = vmatpush.bf16.msra.mxu2 %v483_v23 }
  0x30   :  { %165 = vmatpush.bf16.msra.mxu0 %v465_v13 }
  0x31   :  { %248 = vmatpush.bf16.msra.mxu1 %v473_v17 }
  0x32   :  { %330 = vmatpush.bf16.msra.mxu2 %v482_v30 }
  0x33   :  { %166 = vmatmul.bf16.vlgmr.msra.gmra.mxu0 %v89_v15 }
  0x36   :  { %331 = vmatpush.bf16.msra.mxu2 %v481_v31 }
  0xb0   :  { %v167_v25 = vpop.f32.mrf.mxu0 }
  0xb1   :  { %v168_v26 = vadd.f32 %v496_v24, %v167_v25 }
  0xb3   :  { %v171_v27 = vmax.f32 %v168_v26, 0.0 }
  0xb5   :  { %v172_v28 = vpack.c.bf16 %v171_v27, %v171_v27 }
  0xb7   :  { %249 = vmatmul.bf16.vlgmr.msra.gmra.mxu1 %v172_v28 }
  0xb8   :  { %v169_v29 = vpop.f32.mrf.mxu0 }
 0x134   :  { %v250_v33 = vpop.f32.mrf.mxu1 }
 0x135   :  { %v251_v34 = vadd.f32 %v497_v32, %v250_v33 }
 0x137   :  { %v254_v35 = vmax.f32 %v251_v34, 0.0 }
 0x139   :  { %v255_v36 = vpack.c.bf16 %v254_v35, %v254_v35 }
 0x13b   :  { %332 = vmatmul.bf16.vlgmr.msra.gmra.mxu2 %v255_v36 }
 0x13c   :  { %v252_v37 = vpop.f32.mrf.mxu1 }
 0x1be   :  { %v333_v39 = vpop.f32.mrf.mxu2 }
 0x1bf   :  { %v334_v40 = vadd.f32 %v498_v38, %v333_v39 }
 0x1c1   :  { %337 = vmax.xlane.f32.xlu0 %v334_v40 }
 0x1c6   :  { %v335_v41 = vpop.f32.mrf.mxu2 }
 0x234   :  { %v338_v42 = vpop.xlane.xlu0 %337 }
 0x235   :  { %v339_v43 = vsub.f32 %v334_v40, %v338_v42 }
 0x237   :  { %v340_v44 = vmul.f32 1.442695, %v339_v43 }
 0x239   :  { %499 = vpow2.f32 %v340_v44 }
 0x23f   :  { %v500_v45 = vpop.eup %499 }
 0x240   :  { %342 = vadd.xlane.f32.xlu0 %v500_v45 }
 0x2b3   :  { %v343_v46 = vpop.xlane.xlu0 %342 }
 0x2b4   :  { %501 = vrcp.f32 %v343_v46 }
 0x2ba   :  { %v502_v47 = vpop.eup %501 }
 0x2bb   :  { %v345_v48 = vmul.f32 %v502_v47, %v343_v46 }
 0x2bd   :  { %v346_v49 = vsub.f32 2.0, %v345_v48 }
 0x2bf   :  { %v347_v50 = vmul.f32 %v502_v47, %v346_v49 }
 0x2c1   :  { %v348_v51 = vmul.f32 %v500_v45, %v347_v50 }
 0x2c3   :  { %349 = vst [vmem:[#allocation10] sm:$0xff] %v348_v51 }
 0x2c4   :  { %360 = dma.vmem_to_hbm [thread:$0]  %s356_s24, 128, %s358_s6, [#allocation4]  }
 0x2c5   :  { %629 = dma.done.wait [#allocation4], 128  }
 0x2c6   :  { %630 = vsyncadd [#allocation4], 4294967168 }
 0x2c7   :  { %365 = vsyncpa [#allocation3], 1 }
 0x2c8   :  { %366 = vsyncpa [#allocation6], 1 }
 0x2c9   :  { %367 = vsyncpa [#allocation9], 1 }
 0x2ca   :  { %368 = vsyncpa [#allocation4], 1 }

</bundles_post_ra>
